<compile_context>
chip_gen: v7x
topology: tpu7x:2x2x1
jax: 0.10.0
libtpu: 0.0.40
codegen_flags: <defaults>
</compile_context>

<pallas_src>
import math

import jax
import jax.numpy as jnp
from jax.experimental import pallas as pl
from jax.experimental.pallas import tpu as pltpu

EPS = 1e-5
LANE = 128
N_LAYERS = 5
N_BN = 4
P_ROWS = 16  # 3 rows per BN block (bias/gamma/beta) * 4 + fc5 bias, padded to 16


def _round_up(n, m):
    return ((n + m - 1) // m) * m


def mlp_kernel(x_ref, w_ref, p_ref, out_ref):
    h = x_ref[...]  # [B, D_PAD], zero-padded past input_size

    for l in range(N_BN):  # fc_{l+1} -> (dropout) -> relu -> bn_{l+1}
        w = w_ref[l]                          # [D_PAD, D_PAD]
        b = p_ref[pl.ds(3 * l + 0, 1), :]     # [1, D_PAD]
        gamma = p_ref[pl.ds(3 * l + 1, 1), :]
        beta = p_ref[pl.ds(3 * l + 2, 1), :]

        h = jnp.dot(h, w, preferred_element_type=jnp.float32) + b
        # dropout(p=0.2) of the reference is identity here (see TODO above).
        h = jnp.maximum(h, 0.0)
        # BatchNorm1d (training mode): single-pass batch statistics.
        mean = jnp.mean(h, axis=0, keepdims=True)
        mean_sq = jnp.mean(h * h, axis=0, keepdims=True)
        var = jnp.maximum(mean_sq - mean * mean, 0.0)  # guard cancellation
        h = (h - mean) * jax.lax.rsqrt(var + EPS) * gamma + beta

    # fc5 head: lane-dense [B, D_PAD] output; real result lives in column 0.
    out_ref[...] = (
        jnp.dot(h, w_ref[N_BN], preferred_element_type=jnp.float32)
        + p_ref[pl.ds(3 * N_BN, 1), :]
    )


def init_params(key, input_size, hidden_size):
    """Deterministic torch-style init: U(-1/sqrt(fan_in), 1/sqrt(fan_in))."""
    dims = [
        (input_size, hidden_size),
        (hidden_size, hidden_size // 2),
        (hidden_size // 2, hidden_size // 4),
        (hidden_size // 4, hidden_size // 8),
        (hidden_size // 8, 1),
    ]
    params = []
    for i, (fan_in, fan_out) in enumerate(dims):
        kw, kb = jax.random.split(jax.random.fold_in(key, i))
        bound = 1.0 / math.sqrt(fan_in)
        # Weights stored as [in, out] (transposed vs. torch's [out, in]).
        w = jax.random.uniform(kw, (fan_in, fan_out), jnp.float32, -bound, bound)
        b = jax.random.uniform(kb, (1, fan_out), jnp.float32, -bound, bound)
        params.append((w, b))

    bn_dims = [hidden_size, hidden_size // 2, hidden_size // 4, hidden_size // 8]
    bn_params = [
        (jnp.ones((1, d), jnp.float32), jnp.zeros((1, d), jnp.float32))
        for d in bn_dims
    ]
    return params, bn_params


def pack_params(params, bn_params, d_pad):
    """Pack 18 parameter arrays into two zero-padded VMEM slabs."""
    w_slab = jnp.zeros((N_LAYERS, d_pad, d_pad), jnp.float32)
    for l, (w, _) in enumerate(params):
        w_slab = w_slab.at[l, : w.shape[0], : w.shape[1]].set(w)

    p_slab = jnp.zeros((P_ROWS, d_pad), jnp.float32)
    for l in range(N_BN):
        b = params[l][1]
        gamma, beta = bn_params[l]
        p_slab = p_slab.at[3 * l + 0, : b.shape[1]].set(b[0])
        p_slab = p_slab.at[3 * l + 1, : gamma.shape[1]].set(gamma[0])
        p_slab = p_slab.at[3 * l + 2, : beta.shape[1]].set(beta[0])
    b5 = params[N_BN][1]
    p_slab = p_slab.at[3 * N_BN, : b5.shape[1]].set(b5[0])
    return w_slab, p_slab


def clothes_price_mlp(x, w_slab, p_slab):
    batch = x.shape[0]
    d_pad = w_slab.shape[-1]
    x_pad = jnp.zeros((batch, d_pad), jnp.float32).at[:, : x.shape[1]].set(x)

    vmem = pl.BlockSpec(memory_space=pltpu.MemorySpace.VMEM)
    out_pad = pl.pallas_call(
        mlp_kernel,
        out_shape=jax.ShapeDtypeStruct((batch, d_pad), jnp.float32),
        in_specs=[vmem, vmem, vmem],
        out_specs=vmem,
    )(x_pad, w_slab, p_slab)
    return out_pad[:, :1]  # lane-dense slab -> (B, 1)


def reference_forward(x, params, bn_params):
    """Pure-JAX reference of the same (identity-dropout, train-BN) semantics."""
    (w1, b1), (w2, b2), (w3, b3), (w4, b4), (w5, b5) = params
    (g1, be1), (g2, be2), (g3, be3), (g4, be4) = bn_params

    def bn(h, g, b):
        m = jnp.mean(h, axis=0, keepdims=True)
        v = jnp.mean((h - m) ** 2, axis=0, keepdims=True)
        return (h - m) / jnp.sqrt(v + EPS) * g + b

    h = bn(jnp.maximum(x @ w1 + b1, 0.0), g1, be1)
    h = bn(jnp.maximum(h @ w2 + b2, 0.0), g2, be2)
    h = bn(jnp.maximum(h @ w3 + b3, 0.0), g3, be3)
    h = bn(jnp.maximum(h @ w4 + b4, 0.0), g4, be4)
    return h @ w5 + b5


if __name__ == "__main__":
    key = jax.random.PRNGKey(0)
    batch, input_size, hidden_size = 8, 16, 32

    k_x, k_p = jax.random.split(key)
    x = jax.random.normal(k_x, (batch, input_size), jnp.float32)
    params, bn_params = init_params(k_p, input_size, hidden_size)

    d_pad = _round_up(max(input_size, hidden_size), LANE)
    w_slab, p_slab = pack_params(params, bn_params, d_pad)

    out = clothes_price_mlp(x, w_slab, p_slab)
    out = jax.block_until_ready(out)

    ref = reference_forward(x, params, bn_params)
    assert out.shape == (batch, 1)
    assert jnp.allclose(out, ref, atol=1e-4, rtol=1e-4), (out, ref)

    print("KERNEL_OK")
</pallas_src>

<mosaic_0001>
module attributes {stable_mosaic.version = 11 : i64} {
  func.func @mlp_kernel(%arg0: memref<8x128xf32, #tpu.memory_space<vmem>>, %arg1: memref<5x128x128xf32, #tpu.memory_space<vmem>>, %arg2: memref<16x128xf32, #tpu.memory_space<vmem>>, %arg3: memref<8x128xf32, #tpu.memory_space<vmem>>) attributes {dimension_semantics = [], scalar_prefetch = 0 : i64, scratch_operands = 0 : i64, tpu.core_type = #tpu.core_type<tc>} {
    %c0 = arith.constant 0 : index
    %c0_0 = arith.constant 0 : index
    %0 = vector.load %arg0[%c0, %c0_0] : memref<8x128xf32, #tpu.memory_space<vmem>>, vector<8x128xf32>
    %c0_1 = arith.constant 0 : index
    %c0_2 = arith.constant 0 : index
    %c0_3 = arith.constant 0 : index
    %1 = vector.load %arg1[%c0_1, %c0_2, %c0_3] : memref<5x128x128xf32, #tpu.memory_space<vmem>>, vector<1x128x128xf32>
    %2 = vector.shape_cast %1 : vector<1x128x128xf32> to vector<128x128xf32>
    %c0_4 = arith.constant 0 : index
    %c0_5 = arith.constant 0 : index
    %3 = vector.load %arg2[%c0_4, %c0_5] : memref<16x128xf32, #tpu.memory_space<vmem>>, vector<1x128xf32>
    %c1 = arith.constant 1 : index
    %c0_6 = arith.constant 0 : index
    %4 = vector.load %arg2[%c1, %c0_6] : memref<16x128xf32, #tpu.memory_space<vmem>>, vector<1x128xf32>
    %c2 = arith.constant 2 : index
    %c0_7 = arith.constant 0 : index
    %5 = vector.load %arg2[%c2, %c0_7] : memref<16x128xf32, #tpu.memory_space<vmem>>, vector<1x128xf32>
    %cst = arith.constant dense<0.000000e+00> : vector<8x128xf32>
    %6 = tpu.matmul %0, %2, %cst {dimension_numbers = #tpu.dot_dimension_numbers<[1], [0], [0], [1], [0, 0, 1, 1], [], []>} : vector<8x128xf32>, vector<128x128xf32>, vector<8x128xf32> -> vector<8x128xf32>
    %7 = vector.broadcast %3 : vector<1x128xf32> to vector<8x128xf32>
    %8 = arith.addf %6, %7 : vector<8x128xf32>
    %cst_8 = arith.constant 0.000000e+00 : f32
    %9 = vector.broadcast %cst_8 : f32 to vector<8x128xf32>
    %10 = arith.maximumf %8, %9 : vector<8x128xf32>
    %cst_9 = arith.constant dense<0.000000e+00> : vector<128xf32>
    %11 = vector.multi_reduction <add>, %10, %cst_9 [0] : vector<8x128xf32> to vector<128xf32>
    %12 = vector.shape_cast %11 : vector<128xf32> to vector<1x128xf32>
    %cst_10 = arith.constant 8.000000e+00 : f32
    %13 = vector.broadcast %cst_10 : f32 to vector<1x128xf32>
    %14 = arith.divf %12, %13 : vector<1x128xf32>
    %15 = arith.mulf %10, %10 : vector<8x128xf32>
    %cst_11 = arith.constant dense<0.000000e+00> : vector<128xf32>
    %16 = vector.multi_reduction <add>, %15, %cst_11 [0] : vector<8x128xf32> to vector<128xf32>
    %17 = vector.shape_cast %16 : vector<128xf32> to vector<1x128xf32>
    %cst_12 = arith.constant 8.000000e+00 : f32
    %18 = vector.broadcast %cst_12 : f32 to vector<1x128xf32>
    %19 = arith.divf %17, %18 : vector<1x128xf32>
    %20 = arith.mulf %14, %14 : vector<1x128xf32>
    %21 = arith.subf %19, %20 : vector<1x128xf32>
    %cst_13 = arith.constant 0.000000e+00 : f32
    %22 = vector.broadcast %cst_13 : f32 to vector<1x128xf32>
    %23 = arith.maximumf %21, %22 : vector<1x128xf32>
    %24 = vector.broadcast %14 : vector<1x128xf32> to vector<8x128xf32>
    %25 = arith.subf %10, %24 : vector<8x128xf32>
    %cst_14 = arith.constant 9.99999974E-6 : f32
    %26 = vector.broadcast %cst_14 : f32 to vector<1x128xf32>
    %27 = arith.addf %23, %26 : vector<1x128xf32>
    %28 = math.rsqrt %27 : vector<1x128xf32>
    %29 = vector.broadcast %28 : vector<1x128xf32> to vector<8x128xf32>
    %30 = arith.mulf %25, %29 : vector<8x128xf32>
    %31 = vector.broadcast %4 : vector<1x128xf32> to vector<8x128xf32>
    %32 = arith.mulf %30, %31 : vector<8x128xf32>
    %33 = vector.broadcast %5 : vector<1x128xf32> to vector<8x128xf32>
    %34 = arith.addf %32, %33 : vector<8x128xf32>
    %c1_15 = arith.constant 1 : index
    %c0_16 = arith.constant 0 : index
    %c0_17 = arith.constant 0 : index
    %35 = vector.load %arg1[%c1_15, %c0_16, %c0_17] : memref<5x128x128xf32, #tpu.memory_space<vmem>>, vector<1x128x128xf32>
    %36 = vector.shape_cast %35 : vector<1x128x128xf32> to vector<128x128xf32>
    %c3 = arith.constant 3 : index
    %c0_18 = arith.constant 0 : index
    %37 = vector.load %arg2[%c3, %c0_18] : memref<16x128xf32, #tpu.memory_space<vmem>>, vector<1x128xf32>
    %c4 = arith.constant 4 : index
    %c0_19 = arith.constant 0 : index
    %38 = vector.load %arg2[%c4, %c0_19] : memref<16x128xf32, #tpu.memory_space<vmem>>, vector<1x128xf32>
    %c5 = arith.constant 5 : index
    %c0_20 = arith.constant 0 : index
    %39 = vector.load %arg2[%c5, %c0_20] : memref<16x128xf32, #tpu.memory_space<vmem>>, vector<1x128xf32>
    %cst_21 = arith.constant dense<0.000000e+00> : vector<8x128xf32>
    %40 = tpu.matmul %34, %36, %cst_21 {dimension_numbers = #tpu.dot_dimension_numbers<[1], [0], [0], [1], [0, 0, 1, 1], [], []>} : vector<8x128xf32>, vector<128x128xf32>, vector<8x128xf32> -> vector<8x128xf32>
    %41 = vector.broadcast %37 : vector<1x128xf32> to vector<8x128xf32>
    %42 = arith.addf %40, %41 : vector<8x128xf32>
    %cst_22 = arith.constant 0.000000e+00 : f32
    %43 = vector.broadcast %cst_22 : f32 to vector<8x128xf32>
    %44 = arith.maximumf %42, %43 : vector<8x128xf32>
    %cst_23 = arith.constant dense<0.000000e+00> : vector<128xf32>
    %45 = vector.multi_reduction <add>, %44, %cst_23 [0] : vector<8x128xf32> to vector<128xf32>
    %46 = vector.shape_cast %45 : vector<128xf32> to vector<1x128xf32>
    %cst_24 = arith.constant 8.000000e+00 : f32
    %47 = vector.broadcast %cst_24 : f32 to vector<1x128xf32>
    %48 = arith.divf %46, %47 : vector<1x128xf32>
    %49 = arith.mulf %44, %44 : vector<8x128xf32>
    %cst_25 = arith.constant dense<0.000000e+00> : vector<128xf32>
    %50 = vector.multi_reduction <add>, %49, %cst_25 [0] : vector<8x128xf32> to vector<128xf32>
    %51 = vector.shape_cast %50 : vector<128xf32> to vector<1x128xf32>
    %cst_26 = arith.constant 8.000000e+00 : f32
    %52 = vector.broadcast %cst_26 : f32 to vector<1x128xf32>
    %53 = arith.divf %51, %52 : vector<1x128xf32>
    %54 = arith.mulf %48, %48 : vector<1x128xf32>
    %55 = arith.subf %53, %54 : vector<1x128xf32>
    %cst_27 = arith.constant 0.000000e+00 : f32
    %56 = vector.broadcast %cst_27 : f32 to vector<1x128xf32>
    %57 = arith.maximumf %55, %56 : vector<1x128xf32>
    %58 = vector.broadcast %48 : vector<1x128xf32> to vector<8x128xf32>
    %59 = arith.subf %44, %58 : vector<8x128xf32>
    %cst_28 = arith.constant 9.99999974E-6 : f32
    %60 = vector.broadcast %cst_28 : f32 to vector<1x128xf32>
    %61 = arith.addf %57, %60 : vector<1x128xf32>
    %62 = math.rsqrt %61 : vector<1x128xf32>
    %63 = vector.broadcast %62 : vector<1x128xf32> to vector<8x128xf32>
    %64 = arith.mulf %59, %63 : vector<8x128xf32>
    %65 = vector.broadcast %38 : vector<1x128xf32> to vector<8x128xf32>
    %66 = arith.mulf %64, %65 : vector<8x128xf32>
    %67 = vector.broadcast %39 : vector<1x128xf32> to vector<8x128xf32>
    %68 = arith.addf %66, %67 : vector<8x128xf32>
    %c2_29 = arith.constant 2 : index
    %c0_30 = arith.constant 0 : index
    %c0_31 = arith.constant 0 : index
    %69 = vector.load %arg1[%c2_29, %c0_30, %c0_31] : memref<5x128x128xf32, #tpu.memory_space<vmem>>, vector<1x128x128xf32>
    %70 = vector.shape_cast %69 : vector<1x128x128xf32> to vector<128x128xf32>
    %c6 = arith.constant 6 : index
    %c0_32 = arith.constant 0 : index
    %71 = vector.load %arg2[%c6, %c0_32] : memref<16x128xf32, #tpu.memory_space<vmem>>, vector<1x128xf32>
    %c7 = arith.constant 7 : index
    %c0_33 = arith.constant 0 : index
    %72 = vector.load %arg2[%c7, %c0_33] : memref<16x128xf32, #tpu.memory_space<vmem>>, vector<1x128xf32>
    %c8 = arith.constant 8 : index
    %c0_34 = arith.constant 0 : index
    %73 = vector.load %arg2[%c8, %c0_34] : memref<16x128xf32, #tpu.memory_space<vmem>>, vector<1x128xf32>
    %cst_35 = arith.constant dense<0.000000e+00> : vector<8x128xf32>
    %74 = tpu.matmul %68, %70, %cst_35 {dimension_numbers = #tpu.dot_dimension_numbers<[1], [0], [0], [1], [0, 0, 1, 1], [], []>} : vector<8x128xf32>, vector<128x128xf32>, vector<8x128xf32> -> vector<8x128xf32>
    %75 = vector.broadcast %71 : vector<1x128xf32> to vector<8x128xf32>
    %76 = arith.addf %74, %75 : vector<8x128xf32>
    %cst_36 = arith.constant 0.000000e+00 : f32
    %77 = vector.broadcast %cst_36 : f32 to vector<8x128xf32>
    %78 = arith.maximumf %76, %77 : vector<8x128xf32>
    %cst_37 = arith.constant dense<0.000000e+00> : vector<128xf32>
    %79 = vector.multi_reduction <add>, %78, %cst_37 [0] : vector<8x128xf32> to vector<128xf32>
    %80 = vector.shape_cast %79 : vector<128xf32> to vector<1x128xf32>
    %cst_38 = arith.constant 8.000000e+00 : f32
    %81 = vector.broadcast %cst_38 : f32 to vector<1x128xf32>
    %82 = arith.divf %80, %81 : vector<1x128xf32>
    %83 = arith.mulf %78, %78 : vector<8x128xf32>
    %cst_39 = arith.constant dense<0.000000e+00> : vector<128xf32>
    %84 = vector.multi_reduction <add>, %83, %cst_39 [0] : vector<8x128xf32> to vector<128xf32>
    %85 = vector.shape_cast %84 : vector<128xf32> to vector<1x128xf32>
    %cst_40 = arith.constant 8.000000e+00 : f32
    %86 = vector.broadcast %cst_40 : f32 to vector<1x128xf32>
    %87 = arith.divf %85, %86 : vector<1x128xf32>
    %88 = arith.mulf %82, %82 : vector<1x128xf32>
    %89 = arith.subf %87, %88 : vector<1x128xf32>
    %cst_41 = arith.constant 0.000000e+00 : f32
    %90 = vector.broadcast %cst_41 : f32 to vector<1x128xf32>
    %91 = arith.maximumf %89, %90 : vector<1x128xf32>
    %92 = vector.broadcast %82 : vector<1x128xf32> to vector<8x128xf32>
    %93 = arith.subf %78, %92 : vector<8x128xf32>
    %cst_42 = arith.constant 9.99999974E-6 : f32
    %94 = vector.broadcast %cst_42 : f32 to vector<1x128xf32>
    %95 = arith.addf %91, %94 : vector<1x128xf32>
    %96 = math.rsqrt %95 : vector<1x128xf32>
    %97 = vector.broadcast %96 : vector<1x128xf32> to vector<8x128xf32>
    %98 = arith.mulf %93, %97 : vector<8x128xf32>
    %99 = vector.broadcast %72 : vector<1x128xf32> to vector<8x128xf32>
    %100 = arith.mulf %98, %99 : vector<8x128xf32>
    %101 = vector.broadcast %73 : vector<1x128xf32> to vector<8x128xf32>
    %102 = arith.addf %100, %101 : vector<8x128xf32>
    %c3_43 = arith.constant 3 : index
    %c0_44 = arith.constant 0 : index
    %c0_45 = arith.constant 0 : index
    %103 = vector.load %arg1[%c3_43, %c0_44, %c0_45] : memref<5x128x128xf32, #tpu.memory_space<vmem>>, vector<1x128x128xf32>
    %104 = vector.shape_cast %103 : vector<1x128x128xf32> to vector<128x128xf32>
    %c9 = arith.constant 9 : index
    %c0_46 = arith.constant 0 : index
    %105 = vector.load %arg2[%c9, %c0_46] : memref<16x128xf32, #tpu.memory_space<vmem>>, vector<1x128xf32>
    %c10 = arith.constant 10 : index
    %c0_47 = arith.constant 0 : index
    %106 = vector.load %arg2[%c10, %c0_47] : memref<16x128xf32, #tpu.memory_space<vmem>>, vector<1x128xf32>
    %c11 = arith.constant 11 : index
    %c0_48 = arith.constant 0 : index
    %107 = vector.load %arg2[%c11, %c0_48] : memref<16x128xf32, #tpu.memory_space<vmem>>, vector<1x128xf32>
    %cst_49 = arith.constant dense<0.000000e+00> : vector<8x128xf32>
    %108 = tpu.matmul %102, %104, %cst_49 {dimension_numbers = #tpu.dot_dimension_numbers<[1], [0], [0], [1], [0, 0, 1, 1], [], []>} : vector<8x128xf32>, vector<128x128xf32>, vector<8x128xf32> -> vector<8x128xf32>
    %109 = vector.broadcast %105 : vector<1x128xf32> to vector<8x128xf32>
    %110 = arith.addf %108, %109 : vector<8x128xf32>
    %cst_50 = arith.constant 0.000000e+00 : f32
    %111 = vector.broadcast %cst_50 : f32 to vector<8x128xf32>
    %112 = arith.maximumf %110, %111 : vector<8x128xf32>
    %cst_51 = arith.constant dense<0.000000e+00> : vector<128xf32>
    %113 = vector.multi_reduction <add>, %112, %cst_51 [0] : vector<8x128xf32> to vector<128xf32>
    %114 = vector.shape_cast %113 : vector<128xf32> to vector<1x128xf32>
    %cst_52 = arith.constant 8.000000e+00 : f32
    %115 = vector.broadcast %cst_52 : f32 to vector<1x128xf32>
    %116 = arith.divf %114, %115 : vector<1x128xf32>
    %117 = arith.mulf %112, %112 : vector<8x128xf32>
    %cst_53 = arith.constant dense<0.000000e+00> : vector<128xf32>
    %118 = vector.multi_reduction <add>, %117, %cst_53 [0] : vector<8x128xf32> to vector<128xf32>
    %119 = vector.shape_cast %118 : vector<128xf32> to vector<1x128xf32>
    %cst_54 = arith.constant 8.000000e+00 : f32
    %120 = vector.broadcast %cst_54 : f32 to vector<1x128xf32>
    %121 = arith.divf %119, %120 : vector<1x128xf32>
    %122 = arith.mulf %116, %116 : vector<1x128xf32>
    %123 = arith.subf %121, %122 : vector<1x128xf32>
    %cst_55 = arith.constant 0.000000e+00 : f32
    %124 = vector.broadcast %cst_55 : f32 to vector<1x128xf32>
    %125 = arith.maximumf %123, %124 : vector<1x128xf32>
    %126 = vector.broadcast %116 : vector<1x128xf32> to vector<8x128xf32>
    %127 = arith.subf %112, %126 : vector<8x128xf32>
    %cst_56 = arith.constant 9.99999974E-6 : f32
    %128 = vector.broadcast %cst_56 : f32 to vector<1x128xf32>
    %129 = arith.addf %125, %128 : vector<1x128xf32>
    %130 = math.rsqrt %129 : vector<1x128xf32>
    %131 = vector.broadcast %130 : vector<1x128xf32> to vector<8x128xf32>
    %132 = arith.mulf %127, %131 : vector<8x128xf32>
    %133 = vector.broadcast %106 : vector<1x128xf32> to vector<8x128xf32>
    %134 = arith.mulf %132, %133 : vector<8x128xf32>
    %135 = vector.broadcast %107 : vector<1x128xf32> to vector<8x128xf32>
    %136 = arith.addf %134, %135 : vector<8x128xf32>
    %c4_57 = arith.constant 4 : index
    %c0_58 = arith.constant 0 : index
    %c0_59 = arith.constant 0 : index
    %137 = vector.load %arg1[%c4_57, %c0_58, %c0_59] : memref<5x128x128xf32, #tpu.memory_space<vmem>>, vector<1x128x128xf32>
    %138 = vector.shape_cast %137 : vector<1x128x128xf32> to vector<128x128xf32>
    %cst_60 = arith.constant dense<0.000000e+00> : vector<8x128xf32>
    %139 = tpu.matmul %136, %138, %cst_60 {dimension_numbers = #tpu.dot_dimension_numbers<[1], [0], [0], [1], [0, 0, 1, 1], [], []>} : vector<8x128xf32>, vector<128x128xf32>, vector<8x128xf32> -> vector<8x128xf32>
    %c12 = arith.constant 12 : index
    %c0_61 = arith.constant 0 : index
    %140 = vector.load %arg2[%c12, %c0_61] : memref<16x128xf32, #tpu.memory_space<vmem>>, vector<1x128xf32>
    %141 = vector.broadcast %140 : vector<1x128xf32> to vector<8x128xf32>
    %142 = arith.addf %139, %141 : vector<8x128xf32>
    %c0_62 = arith.constant 0 : index
    %c0_63 = arith.constant 0 : index
    %143 = vector.load %arg3[%c0_62, %c0_63] : memref<8x128xf32, #tpu.memory_space<vmem>>, vector<8x128xf32>
    tpu.vector_store %arg3[%c0_62, %c0_63], %142 {strides = array<i32>} : memref<8x128xf32, #tpu.memory_space<vmem>>, vector<8x128xf32>,
    return
  }
}

</mosaic_0001>

<bundles_post_ra>
// kernel: tpu_custom_call.1
= control target key start
LH: loop header
LB: loop body
LE: loop exit
PB: predicated region body
PF: predicated region fallthrough
CT: control target
= control target key end

     0   :  { %8 = vsyncpa [#allocation3], 0  ;;  %s1309_s0 = inlined_call_operand.hbm [shape: f32[8,128], index: 0, kind: input, shape index: {}]   ;;  %s1310_s1 = inlined_call_operand.hbm [shape: f32[5,128,128], index: 1, kind: input, shape index: {}]   ;;  %s1311_s2 = inlined_call_operand.hbm [shape: f32[16,128], index: 2, kind: input, shape index: {}]   ;;  %s1312_s3 = inlined_call_operand.hbm [shape: f32[8,128], index: 3, kind: output, shape index: {}]  }
   0x1   :  { %9 = vsyncpa [#allocation6], 0 }
   0x2   :  { %10 = vsyncpa [#allocation4], 0  ;;  %s1176_s12 = smov [#allocation5]   ;;  %s1082_s16 = scalar_lea.hbm %s1310_s1, 10240 }
   0x3   :  { %s26_s13 = sshll.u32 %s1176_s12, 4  ;;  %p1083_p0 = scmp.ne.s32.totalorder %s1310_s1, %s1082_s16  ;;  %s27_s13 = int_to_ptr.vmem [resolvable:$true] %s26_s13 }
   0x4   :  { %p1086_p1 = scmp.lt.u32.totalorder %s1082_s16, %s1310_s1 }
   0x6   :  { %p1088_p2 = pnand %p1086_p1, %p1083_p0 }
   0x8   :  { %1091 = shalt.err (!%p1088_p2)
}
   0x9   :  { %s1092_s21 = scalar_lea.vmem %s27_s13, 10240  ;;  %p1097_p4 = scmp.lt.s32.totalorder %s27_s13, %s27_s13 }
   0xa   :  { %p1093_p3 = scmp.ne.s32.totalorder %s27_s13, %s1092_s21  ;;  %p1098_p5 = scmp.lt.s32.totalorder %s1092_s21, %s1092_s21 }
   0xc   :  { %p1099_p6 = por %p1098_p5, %p1097_p4 }
   0xe   :  { %p1100_p7 = pnand %p1099_p6, %p1093_p3 }
  0x10   :  { %1103 = shalt.err (!%p1100_p7)
}
  0x11   :  { %s1177_s22 = smov 128   ;;  %s1178_s23 = smov 8  }
  0x12   :  { %32 = dma.hbm_to_vmem [thread:$0]  %s1310_s1, 10240, %s27_s13, [#allocation6], %s1177_s22, %s1177_s22, %s1178_s23  }
  0x13   :  { %s1179_s26 = smov [#allocation2]   ;;  %s1180_s28 = smov [#allocation7]  }
  0x14   :  { %s17_s27 = sshll.u32 %s1179_s26, 4  ;;  %s38_s29 = sshll.u32 %s1180_s28, 4  ;;  %s18_s27 = int_to_ptr.vmem [resolvable:$true] %s17_s27  ;;  %s39_s29 = int_to_ptr.vmem [resolvable:$true] %s38_s29 }
  0x15   :  { %s1104_s5 = scalar_lea.hbm %s1309_s0, 128 }
  0x16   :  { %p1105_p8 = scmp.ne.s32.totalorder %s1309_s0, %s1104_s5  ;;  %p1108_p9 = scmp.lt.u32.totalorder %s1104_s5, %s1309_s0 }
  0x18   :  { %p1110_p10 = pnand %p1108_p9, %p1105_p8 }
  0x1a   :  { %1113 = shalt.err (!%p1110_p10)
}
  0x1b   :  { %s1114_s1 = scalar_lea.vmem %s18_s27, 128  ;;  %p1119_p12 = scmp.lt.s32.totalorder %s18_s27, %s18_s27 }
  0x1c   :  { %p1115_p11 = scmp.ne.s32.totalorder %s18_s27, %s1114_s1  ;;  %p1120_p13 = scmp.lt.s32.totalorder %s1114_s1, %s1114_s1 }
  0x1e   :  { %p1121_p0 = por %p1120_p13, %p1119_p12 }
  0x20   :  { %p1122_p1 = pnand %p1121_p0, %p1115_p11 }
  0x22   :  { %1125 = shalt.err (!%p1122_p1)
}
  0x23   :  { %20 = dma.hbm_to_vmem [thread:$0]  %s1309_s0, 128, %s18_s27, [#allocation3]  }
  0x24   :  { %s1126_s14 = scalar_lea.hbm %s1311_s2, 256 }
  0x25   :  { %p1127_p2 = scmp.ne.s32.totalorder %s1311_s2, %s1126_s14  ;;  %p1130_p3 = scmp.lt.u32.totalorder %s1126_s14, %s1311_s2 }
  0x27   :  { %p1132_p4 = pnand %p1130_p3, %p1127_p2 }
  0x29   :  { %1135 = shalt.err (!%p1132_p4)
}
  0x2a   :  { %s1136_s19 = scalar_lea.vmem %s39_s29, 256  ;;  %p1141_p6 = scmp.lt.s32.totalorder %s39_s29, %s39_s29 }
  0x2b   :  { %p1137_p5 = scmp.ne.s32.totalorder %s39_s29, %s1136_s19  ;;  %p1142_p7 = scmp.lt.s32.totalorder %s1136_s19, %s1136_s19 }
  0x2d   :  { %p1143_p8 = por %p1142_p7, %p1141_p6 }
  0x2f   :  { %p1144_p9 = pnand %p1143_p8, %p1137_p5 }
  0x31   :  { %1147 = shalt.err (!%p1144_p9)
}
  0x32   :  { %44 = dma.hbm_to_vmem [thread:$0]  %s1311_s2, 256, %s39_s29, [#allocation6], %s1177_s22, %s1177_s22, %s1178_s23  }
  0x33   :  { %1170 = dma.done.wait [#allocation3], 128  }
  0x34   :  { %1171 = vsyncadd [#allocation3], 4294967168 }
  0x35   :  { %1172 = dma.done.wait [#allocation6], 10496  }
  0x36   :  { %1173 = vsyncadd [#allocation6], 4294956800  ;;  %v1181_v0 = vmov 0.0|0.0   ;;  %vm1182_vm0 = vmmov 0   ;;  %v1183_v1 = vmov 0.0   ;;  %v55_v2 = vld [vmem:[#allocation5] sm:$0xff] }
  0x37   :  { %945 = vmatprep.subr.bf16.mxu0 %v1181_v0  ;;  %802 = vmatprep.mubr.msk.f32.mxu0 %vm1182_vm0, %v1183_v1  ;;  %v56_v3 = vld [vmem:[#allocation5 + $0x8] sm:$0xff]  ;;  %v57_v4 = vld [vmem:[#allocation5 + $0x10] sm:$0xff]  ;;  %v58_v6 = vld [vmem:[#allocation5 + $0x18] sm:$0xff]  ;;  %s1184_s2 = smov [#allocation8]  }
  0x38   :  { %969 = vmatprep.subr.bf16.mxu1 %v1181_v0  ;;  %837 = vmatprep.mubr.msk.f32.mxu1 %vm1182_vm0, %v1183_v1  ;;  %v946_v5 = vpack.c.bf16 %v56_v3, %v55_v2  ;;  %v949_v7 = vpack.c.bf16 %v58_v6, %v57_v4  ;;  %v59_v8 = vld [vmem:[#allocation5 + $0x20] sm:$0xff]  ;;  %v60_v9 = vld [vmem:[#allocation5 + $0x28] sm:$0xff]  ;;  %v61_v11 = vld [vmem:[#allocation5 + $0x30] sm:$0xff]  ;;  %s662_s21 = sshll.u32 %s1184_s2, 4  ;;  %s663_s21 = int_to_ptr.vmem [resolvable:$true] %s662_s21 }
  0x39   :  { %v952_v10 = vpack.c.bf16 %v60_v9, %v59_v8  ;;  %v62_v12 = vld [vmem:[#allocation5 + $0x38] sm:$0xff]  ;;  %v63_v14 = vld [vmem:[#allocation5 + $0x40] sm:$0xff]  ;;  %v64_v15 = vld [vmem:[#allocation5 + $0x48] sm:$0xff]  ;;  %s1148_s22 = scalar_lea.vmem %s663_s21, 128  ;;  %p1153_p11 = scmp.lt.s32.totalorder %s663_s21, %s663_s21 }
  0x3a   :  { %947 = vmatpush3.bf16.msra.mxu0 %v946_v5  ;;  %v955_v13 = vpack.c.bf16 %v62_v12, %v61_v11  ;;  %v958_v16 = vpack.c.bf16 %v64_v15, %v63_v14  ;;  %v65_v17 = vld [vmem:[#allocation5 + $0x50] sm:$0xff]  ;;  %v66_v18 = vld [vmem:[#allocation5 + $0x58] sm:$0xff]  ;;  %v67_v20 = vld [vmem:[#allocation5 + $0x60] sm:$0xff]  ;;  %p1149_p10 = scmp.ne.s32.totalorder %s663_s21, %s1148_s22  ;;  %p1154_p12 = scmp.lt.s32.totalorder %s1148_s22, %s1148_s22 }
  0x3b   :  { %948 = vmatprep.subr.bf16.mxu0 %v1181_v0  ;;  %v961_v19 = vpack.c.bf16 %v66_v18, %v65_v17  ;;  %v68_v21 = vld [vmem:[#allocation5 + $0x68] sm:$0xff]  ;;  %v69_v23 = vld [vmem:[#allocation5 + $0x70] sm:$0xff]  ;;  %v70_v24 = vld [vmem:[#allocation5 + $0x78] sm:$0xff] }
  0x3c   :  { %v964_v22 = vpack.c.bf16 %v68_v21, %v67_v20  ;;  %v967_v25 = vpack.c.bf16 %v70_v24, %v69_v23  ;;  %v54_v26 = vld [vmem:[#allocation2] sm:$0xff]  ;;  %v183_v27 = vld [vmem:[#allocation5 + $0x80] sm:$0xff]  ;;  %v184_v28 = vld [vmem:[#allocation5 + $0x88] sm:$0xff]  ;;  %p1155_p13 = por %p1154_p12, %p1153_p11 }
  0x3d   :  { %v970_v29 = vpack.c.bf16 %v184_v28, %v183_v27  ;;  %v185_v30 = vld [vmem:[#allocation5 + $0x90] sm:$0xff]  ;;  %v186_v31 = vld [vmem:[#allocation5 + $0x98] sm:$0xff]  ;;  %v187_v33 = vld [vmem:[#allocation5 + $0xa0] sm:$0xff] }
  0x3e   :  { %950 = vmatpush3.bf16.msra.mxu0 %v949_v7  ;;  %v973_v32 = vpack.c.bf16 %v186_v31, %v185_v30  ;;  %v188_v34 = vld [vmem:[#allocation5 + $0xa8] sm:$0xff]  ;;  %v189_v36 = vld [vmem:[#allocation5 + $0xb0] sm:$0xff]  ;;  %v190_v37 = vld [vmem:[#allocation5 + $0xb8] sm:$0xff]  ;;  %p1156_p0 = pnand %p1155_p13, %p1149_p10 }
  0x3f   :  { %951 = vmatprep.subr.bf16.mxu0 %v1181_v0  ;;  %971 = vmatpush3.bf16.msra.mxu1 %v970_v29  ;;  %v976_v35 = vpack.c.bf16 %v188_v34, %v187_v33  ;;  %v979_v38 = vpack.c.bf16 %v190_v37, %v189_v36  ;;  %v191_v39 = vld [vmem:[#allocation5 + $0xc0] sm:$0xff]  ;;  %v192_v40 = vld [vmem:[#allocation5 + $0xc8] sm:$0xff]  ;;  %v193_v42 = vld [vmem:[#allocation5 + $0xd0] sm:$0xff] }
  0x40   :  { %972 = vmatprep.subr.bf16.mxu1 %v1181_v0  ;;  %v982_v41 = vpack.c.bf16 %v192_v40, %v191_v39  ;;  %v194_v43 = vld [vmem:[#allocation5 + $0xd8] sm:$0xff]  ;;  %v195_v45 = vld [vmem:[#allocation5 + $0xe0] sm:$0xff]  ;;  %v196_v46 = vld [vmem:[#allocation5 + $0xe8] sm:$0xff] }
  0x41   :  { %v985_v44 = vpack.c.bf16 %v194_v43, %v193_v42  ;;  %v988_v47 = vpack.c.bf16 %v196_v46, %v195_v45  ;;  %v197_v48 = vld [vmem:[#allocation5 + $0xf0] sm:$0xff]  ;;  %v198_v49 = vld [vmem:[#allocation5 + $0xf8] sm:$0xff]  ;;  %v672_v51 = vld [vmem:[#allocation7] ss:$0 sm:$0xff] }
  0x42   :  { %953 = vmatpush3.bf16.msra.mxu0 %v952_v10  ;;  %v991_v50 = vpack.c.bf16 %v198_v49, %v197_v48  ;;  %v673_v15 = vld [vmem:[#allocation7 + $0x1] ss:$0 sm:$0xff]  ;;  %v674_v17 = vld [vmem:[#allocation7 + $0x2] ss:$0 sm:$0xff]  ;;  %v311_v21 = vld [vmem:[#allocation5 + $0x108] sm:$0xff] }
  0x43   :  { %954 = vmatprep.subr.bf16.mxu0 %v1181_v0  ;;  %974 = vmatpush3.bf16.msra.mxu1 %v973_v32  ;;  %v310_v20 = vld [vmem:[#allocation5 + $0x100] sm:$0xff]  ;;  %v312_v23 = vld [vmem:[#allocation5 + $0x110] sm:$0xff]  ;;  %v313_v24 = vld [vmem:[#allocation5 + $0x118] sm:$0xff] }
  0x44   :  { %975 = vmatprep.subr.bf16.mxu1 %v1181_v0  ;;  %v315_v27 = vld [vmem:[#allocation5 + $0x128] sm:$0xff]  ;;  %v316_v29 = vld [vmem:[#allocation5 + $0x130] sm:$0xff]  ;;  %v317_v30 = vld [vmem:[#allocation5 + $0x138] sm:$0xff] }
  0x45   :  { %v1003_v31 = vpack.c.bf16 %v317_v30, %v316_v29  ;;  %v318_v32 = vld [vmem:[#allocation5 + $0x140] sm:$0xff]  ;;  %v319_v33 = vld [vmem:[#allocation5 + $0x148] sm:$0xff]  ;;  %v321_v36 = vld [vmem:[#allocation5 + $0x158] sm:$0xff] }
  0x46   :  { %956 = vmatpush3.bf16.msra.mxu0 %v955_v13  ;;  %v1006_v34 = vpack.c.bf16 %v319_v33, %v318_v32  ;;  %v323_v39 = vld [vmem:[#allocation5 + $0x168] sm:$0xff]  ;;  %v325_v42 = vld [vmem:[#allocation5 + $0x178] sm:$0xff]  ;;  %v449_v30 = vld [vmem:[#allocation5 + $0x1e0] sm:$0xff] }
  0x47   :  { %957 = vmatprep.subr.bf16.mxu0 %v1181_v0  ;;  %977 = vmatpush3.bf16.msra.mxu1 %v976_v35  ;;  %v320_v35 = vld [vmem:[#allocation5 + $0x150] sm:$0xff] }
  0x48   :  { %978 = vmatprep.subr.bf16.mxu1 %v1181_v0  ;;  %v1009_v37 = vpack.c.bf16 %v321_v36, %v320_v35  ;;  %v451_v33 = vld [vmem:[#allocation5 + $0x1f0] sm:$0xff]  ;;  %v678_v36 = vld [vmem:[#allocation7 + $0x6] ss:$0 sm:$0xff] }
  0x4a   :  { %959 = vmatpush3.bf16.msra.mxu0 %v958_v16 }
  0x4b   :  { %960 = vmatprep.subr.bf16.mxu0 %v1181_v0  ;;  %980 = vmatpush3.bf16.msra.mxu1 %v979_v38  ;;  %v322_v38 = vld [vmem:[#allocation5 + $0x160] sm:$0xff] }
  0x4c   :  { %981 = vmatprep.subr.bf16.mxu1 %v1181_v0  ;;  %v1012_v40 = vpack.c.bf16 %v323_v39, %v322_v38 }
  0x4e   :  { %962 = vmatpush3.bf16.msra.mxu0 %v961_v19 }
  0x4f   :  { %963 = vmatprep.subr.bf16.mxu0 %v1181_v0  ;;  %983 = vmatpush3.bf16.msra.mxu1 %v982_v41  ;;  %v324_v41 = vld [vmem:[#allocation5 + $0x170] sm:$0xff] }
  0x50   :  { %984 = vmatprep.subr.bf16.mxu1 %v1181_v0  ;;  %v1015_v43 = vpack.c.bf16 %v325_v42, %v324_v41 }
  0x52   :  { %965 = vmatpush3.bf16.msra.mxu0 %v964_v22  ;;  %v994_v22 = vpack.c.bf16 %v311_v21, %v310_v20  ;;  %v442_v20 = vld [vmem:[#allocation5 + $0x1a8] sm:$0xff] }
  0x53   :  { %966 = vmatprep.subr.bf16.mxu0 %v1181_v0  ;;  %986 = vmatpush3.bf16.msra.mxu1 %v985_v44  ;;  %v675_v44 = vld [vmem:[#allocation7 + $0x3] ss:$0 sm:$0xff] }
  0x54   :  { %987 = vmatprep.subr.bf16.mxu1 %v1181_v0 }
  0x56   :  { %968 = vmatpush3.bf16.msra.mxu0 %v967_v25  ;;  %v997_v25 = vpack.c.bf16 %v313_v24, %v312_v23  ;;  %v445_v24 = vld [vmem:[#allocation5 + $0x1c0] sm:$0xff] }
  0x57   :  { %993 = vmatprep.subr.bf16.mxu0 %v1181_v0  ;;  %989 = vmatpush3.bf16.msra.mxu1 %v988_v47 }
  0x58   :  { %990 = vmatprep.subr.bf16.mxu1 %v1181_v0 }
  0x59   :  { %803 = vmatmul.mubr.f32.vlgmr.msra.gmra.mrb[0].mxu0 %v54_v26  ;;  %v314_v26 = vld [vmem:[#allocation5 + $0x120] sm:$0xff] }
  0x5a   :  { %872 = vmatprep.mubr.msk.f32.mxu0 %vm1182_vm0, %v1183_v1  ;;  %995 = vmatpush3.bf16.msra.mxu0 %v994_v22  ;;  %v1000_v28 = vpack.c.bf16 %v315_v27, %v314_v26  ;;  %v443_v22 = vld [vmem:[#allocation5 + $0x1b0] sm:$0xff] }
  0x5b   :  { %992 = vmatpush3.bf16.msra.mxu1 %v991_v50  ;;  %996 = vmatprep.subr.bf16.mxu0 %v1181_v0  ;;  %v447_v27 = vld [vmem:[#allocation5 + $0x1d0] sm:$0xff] }
  0x5c   :  { %1017 = vmatprep.subr.bf16.mxu1 %v1181_v0 }
  0x5e   :  { %998 = vmatpush3.bf16.msra.mxu0 %v997_v25  ;;  %v446_v25 = vld [vmem:[#allocation5 + $0x1c8] sm:$0xff] }
  0x5f   :  { %999 = vmatprep.subr.bf16.mxu0 %v1181_v0  ;;  %v1030_v26 = vpack.c.bf16 %v446_v25, %v445_v24  ;;  %v578_v25 = vld [vmem:[#allocation5 + $0x270] sm:$0xff] }
  0x62   :  { %1001 = vmatpush3.bf16.msra.mxu0 %v1000_v28  ;;  %v448_v28 = vld [vmem:[#allocation5 + $0x1d8] sm:$0xff] }
  0x63   :  { %1002 = vmatprep.subr.bf16.mxu0 %v1181_v0  ;;  %v1033_v29 = vpack.c.bf16 %v448_v28, %v447_v27  ;;  %v681_v28 = vld [vmem:[#allocation7 + $0x9] ss:$0 sm:$0xff] }
  0x66   :  { %1004 = vmatpush3.bf16.msra.mxu0 %v1003_v31  ;;  %v450_v31 = vld [vmem:[#allocation5 + $0x1e8] sm:$0xff] }
  0x67   :  { %1005 = vmatprep.subr.bf16.mxu0 %v1181_v0  ;;  %v1036_v32 = vpack.c.bf16 %v450_v31, %v449_v30 }
  0x6a   :  { %1007 = vmatpush3.bf16.msra.mxu0 %v1006_v34  ;;  %v452_v34 = vld [vmem:[#allocation5 + $0x1f8] sm:$0xff] }
  0x6b   :  { %1008 = vmatprep.subr.bf16.mxu0 %v1181_v0  ;;  %v1039_v35 = vpack.c.bf16 %v452_v34, %v451_v33 }
  0x6e   :  { %1010 = vmatpush3.bf16.msra.mxu0 %v1009_v37 }
  0x6f   :  { %1011 = vmatprep.subr.bf16.mxu0 %v1181_v0 }
  0x72   :  { %1013 = vmatpush3.bf16.msra.mxu0 %v1012_v40 }
  0x73   :  { %1014 = vmatprep.subr.bf16.mxu0 %v1181_v0 }
  0x76   :  { %1016 = vmatpush3.bf16.msra.mxu0 %v1015_v43 }
  0x77   :  { %1041 = vmatprep.subr.bf16.mxu0 %v1181_v0 }
 0x12c   :  { %v144_v52 = vpop.f32.mrb[0].mxu0 }
 0x12d   :  { %v145_v53 = vadd.f32 %v672_v51, %v144_v52  ;;  %v804_v54 = vpop.f32.mrb[1].mxu0 }
 0x12f   :  { %v148_v55 = vmax.f32 %v145_v53, 0.0 }
 0x131   :  { %v149_v56 = vrot.slane %v148_v55, 4  ;;  %v157_v57 = vmul.f32 %v148_v55, %v148_v55 }
 0x133   :  { %v150_v58 = vadd.f32 %v149_v56, %v148_v55  ;;  %v158_v59 = vrot.slane %v157_v57, 4 }
 0x135   :  { %v151_v60 = vrot.slane %v150_v58, 2  ;;  %v159_v61 = vadd.f32 %v158_v59, %v157_v57 }
 0x137   :  { %v152_v62 = vadd.f32 %v151_v60, %v150_v58  ;;  %v160_v63 = vrot.slane %v159_v61, 2 }
 0x139   :  { %v153_v2 = vrot.slane %v152_v62, 1  ;;  %v161_v3 = vadd.f32 %v160_v63, %v159_v61 }
 0x13b   :  { %v154_v4 = vadd.f32 %v153_v2, %v152_v62  ;;  %v162_v5 = vrot.slane %v161_v3, 1 }
 0x13d   :  { %v156_v6 = vmul.f32 0.125, %v154_v4  ;;  %v163_v7 = vadd.f32 %v162_v5, %v161_v3 }
 0x13f   :  { %v164_v8 = vmul.f32 0.125, %v163_v7  ;;  %v165_v9 = vmul.f32 %v156_v6, %v156_v6  ;;  %v168_v13 = vsub.f32 %v148_v55, %v156_v6 }
 0x141   :  { %v166_v10 = vsub.f32 %v164_v8, %v165_v9  ;;  %v676_v8 = vld [vmem:[#allocation7 + $0x4] ss:$0 sm:$0xff] }
 0x143   :  { %v167_v11 = vmax.f32 %v166_v10, 0.0  ;;  %v677_v10 = vld [vmem:[#allocation7 + $0x5] ss:$0 sm:$0xff] }
 0x145   :  { %v169_v12 = vadd.f32 1e-05, %v167_v11 }
 0x147   :  { %1074 = vrsqrt.f32 %v169_v12 }
 0x151   :  { %v1075_v14 = vpop.eup %1074 }
 0x152   :  { %v171_v16 = vmul.f32 %v1075_v14, %v168_v13  ;;  %v437_v13 = vld [vmem:[#allocation5 + $0x180] sm:$0xff]  ;;  %v438_v14 = vld [vmem:[#allocation5 + $0x188] sm:$0xff] }
 0x154   :  { %v176_v18 = vmul.f32 %v673_v15, %v171_v16  ;;  %v1018_v15 = vpack.c.bf16 %v438_v14, %v437_v13  ;;  %v439_v16 = vld [vmem:[#allocation5 + $0x190] sm:$0xff] }
 0x155   :  { %v570_v14 = vld [vmem:[#allocation5 + $0x230] sm:$0xff] }
 0x156   :  { %v181_v19 = vadd.f32 %v674_v17, %v176_v18  ;;  %v440_v17 = vld [vmem:[#allocation5 + $0x198] sm:$0xff] }
 0x157   :  { %v1021_v18 = vpack.c.bf16 %v440_v17, %v439_v16  ;;  %v572_v17 = vld [vmem:[#allocation5 + $0x240] sm:$0xff] }
 0x158   :  { %838 = vmatmul.mubr.f32.vlgmr.msra.gmra.mrb[0].mxu1 %v181_v19  ;;  %v441_v19 = vld [vmem:[#allocation5 + $0x1a0] sm:$0xff] }
 0x159   :  { %907 = vmatprep.mubr.msk.f32.mxu1 %vm1182_vm0, %v1183_v1  ;;  %1019 = vmatpush3.bf16.msra.mxu1 %v1018_v15  ;;  %v1024_v21 = vpack.c.bf16 %v442_v20, %v441_v19  ;;  %v571_v15 = vld [vmem:[#allocation5 + $0x238] sm:$0xff]  ;;  %v574_v20 = vld [vmem:[#allocation5 + $0x250] sm:$0xff] }
 0x15a   :  { %1020 = vmatprep.subr.bf16.mxu1 %v1181_v0  ;;  %v1051_v16 = vpack.c.bf16 %v571_v15, %v570_v14 }
 0x15d   :  { %1022 = vmatpush3.bf16.msra.mxu1 %v1021_v18  ;;  %v573_v18 = vld [vmem:[#allocation5 + $0x248] sm:$0xff] }
 0x15e   :  { %1023 = vmatprep.subr.bf16.mxu1 %v1181_v0  ;;  %v1054_v19 = vpack.c.bf16 %v573_v18, %v572_v17 }
 0x161   :  { %1025 = vmatpush3.bf16.msra.mxu1 %v1024_v21  ;;  %v575_v21 = vld [vmem:[#allocation5 + $0x258] sm:$0xff] }
 0x162   :  { %1026 = vmatprep.subr.bf16.mxu1 %v1181_v0 }
 0x22b   :  { %v272_v45 = vpop.f32.mrb[0].mxu1 }
 0x22c   :  { %v273_v46 = vadd.f32 %v675_v44, %v272_v45  ;;  %v839_v47 = vpop.f32.mrb[1].mxu1 }
 0x22e   :  { %v276_v48 = vmax.f32 %v273_v46, 0.0 }
 0x230   :  { %v277_v49 = vrot.slane %v276_v48, 4  ;;  %v284_v50 = vmul.f32 %v276_v48, %v276_v48 }
 0x232   :  { %v278_v51 = vadd.f32 %v277_v49, %v276_v48  ;;  %v285_v52 = vrot.slane %v284_v50, 4 }
 0x234   :  { %v279_v53 = vrot.slane %v278_v51, 2  ;;  %v286_v54 = vadd.f32 %v285_v52, %v284_v50 }
 0x236   :  { %v280_v55 = vadd.f32 %v279_v53, %v278_v51  ;;  %v287_v56 = vrot.slane %v286_v54, 2 }
 0x238   :  { %v281_v57 = vrot.slane %v280_v55, 1  ;;  %v288_v58 = vadd.f32 %v287_v56, %v286_v54 }
 0x23a   :  { %v282_v59 = vadd.f32 %v281_v57, %v280_v55  ;;  %v289_v60 = vrot.slane %v288_v58, 1 }
 0x23c   :  { %v283_v61 = vmul.f32 0.125, %v282_v59  ;;  %v290_v62 = vadd.f32 %v289_v60, %v288_v58 }
 0x23e   :  { %v291_v63 = vmul.f32 0.125, %v290_v62  ;;  %v292_v2 = vmul.f32 %v283_v61, %v283_v61  ;;  %v295_v6 = vsub.f32 %v276_v48, %v283_v61  ;;  %v679_v62 = vld [vmem:[#allocation7 + $0x7] ss:$0 sm:$0xff] }
 0x240   :  { %v293_v3 = vsub.f32 %v291_v63, %v292_v2  ;;  %v680_v2 = vld [vmem:[#allocation7 + $0x8] ss:$0 sm:$0xff] }
 0x242   :  { %v294_v4 = vmax.f32 %v293_v3, 0.0 }
 0x244   :  { %v296_v5 = vadd.f32 1e-05, %v294_v4 }
 0x246   :  { %1076 = vrsqrt.f32 %v296_v5  ;;  %v564_v5 = vld [vmem:[#allocation5 + $0x200] sm:$0xff] }
 0x250   :  { %v1077_v7 = vpop.eup %1076 }
 0x251   :  { %v298_v9 = vmul.f32 %v1077_v7, %v295_v6  ;;  %v565_v6 = vld [vmem:[#allocation5 + $0x208] sm:$0xff] }
 0x252   :  { %v1042_v7 = vpack.c.bf16 %v565_v6, %v564_v5 }
 0x253   :  { %v303_v11 = vmul.f32 %v676_v8, %v298_v9  ;;  %v566_v8 = vld [vmem:[#allocation5 + $0x210] sm:$0xff]  ;;  %v567_v9 = vld [vmem:[#allocation5 + $0x218] sm:$0xff] }
 0x255   :  { %v308_v12 = vadd.f32 %v677_v10, %v303_v11  ;;  %v1045_v10 = vpack.c.bf16 %v567_v9, %v566_v8  ;;  %v568_v11 = vld [vmem:[#allocation5 + $0x220] sm:$0xff] }
 0x257   :  { %873 = vmatmul.mubr.f32.vlgmr.msra.gmra.mrb[2].mxu0 %v308_v12  ;;  %v569_v12 = vld [vmem:[#allocation5 + $0x228] sm:$0xff] }
 0x258   :  { %942 = vmatprep.mubr.msk.f32.mxu0 %vm1182_vm0, %v1183_v1  ;;  %v444_v1 = vld [vmem:[#allocation5 + $0x1b8] sm:$0xff]  ;;  %1043 = vmatpush3.bf16.msra.mxu0 %v1042_v7  ;;  %v1048_v13 = vpack.c.bf16 %v569_v12, %v568_v11 }
 0x259   :  { %v1027_v23 = vpack.c.bf16 %v444_v1, %v443_v22  ;;  %1044 = vmatprep.subr.bf16.mxu0 %v1181_v0  ;;  %v1057_v22 = vpack.c.bf16 %v575_v21, %v574_v20  ;;  %v576_v1 = vld [vmem:[#allocation5 + $0x260] sm:$0xff] }
 0x25b   :  { %1028 = vmatpush3.bf16.msra.mxu1 %v1027_v23  ;;  %v577_v23 = vld [vmem:[#allocation5 + $0x268] sm:$0xff] }
 0x25c   :  { %1029 = vmatprep.subr.bf16.mxu1 %v1181_v0  ;;  %1046 = vmatpush3.bf16.msra.mxu0 %v1045_v10  ;;  %v1060_v24 = vpack.c.bf16 %v577_v23, %v576_v1 }
 0x25d   :  { %1047 = vmatprep.subr.bf16.mxu0 %v1181_v0 }
 0x25f   :  { %1031 = vmatpush3.bf16.msra.mxu1 %v1030_v26  ;;  %v579_v26 = vld [vmem:[#allocation5 + $0x278] sm:$0xff] }
 0x260   :  { %1032 = vmatprep.subr.bf16.mxu1 %v1181_v0  ;;  %1049 = vmatpush3.bf16.msra.mxu0 %v1048_v13  ;;  %v1063_v27 = vpack.c.bf16 %v579_v26, %v578_v25 }
 0x261   :  { %1050 = vmatprep.subr.bf16.mxu0 %v1181_v0 }
 0x263   :  { %1034 = vmatpush3.bf16.msra.mxu1 %v1033_v29 }
 0x264   :  { %1035 = vmatprep.subr.bf16.mxu1 %v1181_v0  ;;  %1052 = vmatpush3.bf16.msra.mxu0 %v1051_v16 }
 0x265   :  { %1053 = vmatprep.subr.bf16.mxu0 %v1181_v0 }
 0x267   :  { %1037 = vmatpush3.bf16.msra.mxu1 %v1036_v32 }
 0x268   :  { %1038 = vmatprep.subr.bf16.mxu1 %v1181_v0  ;;  %1055 = vmatpush3.bf16.msra.mxu0 %v1054_v19 }
 0x269   :  { %1056 = vmatprep.subr.bf16.mxu0 %v1181_v0 }
 0x26b   :  { %1040 = vmatpush3.bf16.msra.mxu1 %v1039_v35 }
 0x26c   :  { %1058 = vmatpush3.bf16.msra.mxu0 %v1057_v22 }
 0x26d   :  { %1059 = vmatprep.subr.bf16.mxu0 %v1181_v0 }
 0x270   :  { %1061 = vmatpush3.bf16.msra.mxu0 %v1060_v24 }
 0x271   :  { %1062 = vmatprep.subr.bf16.mxu0 %v1181_v0 }
 0x274   :  { %1064 = vmatpush3.bf16.msra.mxu0 %v1063_v27 }
 0x32a   :  { %v399_v37 = vpop.f32.mrb[2].mxu0 }
 0x32b   :  { %v400_v38 = vadd.f32 %v678_v36, %v399_v37  ;;  %v874_v39 = vpop.f32.mrb[3].mxu0 }
 0x32d   :  { %v403_v40 = vmax.f32 %v400_v38, 0.0 }
 0x32f   :  { %v404_v41 = vrot.slane %v403_v40, 4  ;;  %v411_v42 = vmul.f32 %v403_v40, %v403_v40 }
 0x331   :  { %v405_v43 = vadd.f32 %v404_v41, %v403_v40  ;;  %v412_v44 = vrot.slane %v411_v42, 4 }
 0x333   :  { %v406_v45 = vrot.slane %v405_v43, 2  ;;  %v413_v46 = vadd.f32 %v412_v44, %v411_v42 }
 0x335   :  { %v407_v47 = vadd.f32 %v406_v45, %v405_v43  ;;  %v414_v48 = vrot.slane %v413_v46, 2 }
 0x337   :  { %v408_v49 = vrot.slane %v407_v47, 1  ;;  %v415_v50 = vadd.f32 %v414_v48, %v413_v46 }
 0x339   :  { %v409_v51 = vadd.f32 %v408_v49, %v407_v47  ;;  %v416_v52 = vrot.slane %v415_v50, 1 }
 0x33b   :  { %v410_v53 = vmul.f32 0.125, %v409_v51  ;;  %v417_v54 = vadd.f32 %v416_v52, %v415_v50 }
 0x33d   :  { %v418_v55 = vmul.f32 0.125, %v417_v54  ;;  %v419_v56 = vmul.f32 %v410_v53, %v410_v53  ;;  %v422_v60 = vsub.f32 %v403_v40, %v410_v53  ;;  %v682_v53 = vld [vmem:[#allocation7 + $0xa] ss:$0 sm:$0xff] }
 0x33f   :  { %v420_v57 = vsub.f32 %v418_v55, %v419_v56  ;;  %v683_v55 = vld [vmem:[#allocation7 + $0xb] ss:$0 sm:$0xff] }
 0x341   :  { %v421_v58 = vmax.f32 %v420_v57, 0.0 }
 0x343   :  { %v423_v59 = vadd.f32 1e-05, %v421_v58  ;;  %v684_v58 = vld [vmem:[#allocation7 + $0xc] ss:$0 sm:$0xff] }
 0x345   :  { %1078 = vrsqrt.f32 %v423_v59 }
 0x34f   :  { %v1079_v61 = vpop.eup %1078 }
 0x350   :  { %v425_v63 = vmul.f32 %v1079_v61, %v422_v60 }
 0x352   :  { %v430_v3 = vmul.f32 %v679_v62, %v425_v63 }
 0x354   :  { %v435_v4 = vadd.f32 %v680_v2, %v430_v3 }
 0x356   :  { %908 = vmatmul.mubr.f32.vlgmr.msra.gmra.mrb[2].mxu1 %v435_v4 }
 0x429   :  { %v526_v29 = vpop.f32.mrb[2].mxu1 }
 0x42a   :  { %v527_v30 = vadd.f32 %v681_v28, %v526_v29  ;;  %v909_v31 = vpop.f32.mrb[3].mxu1 }
 0x42c   :  { %v530_v32 = vmax.f32 %v527_v30, 0.0 }
 0x42e   :  { %v531_v33 = vrot.slane %v530_v32, 4  ;;  %v538_v34 = vmul.f32 %v530_v32, %v530_v32 }
 0x430   :  { %v532_v35 = vadd.f32 %v531_v33, %v530_v32  ;;  %v539_v36 = vrot.slane %v538_v34, 4 }
 0x432   :  { %v533_v37 = vrot.slane %v532_v35, 2  ;;  %v540_v38 = vadd.f32 %v539_v36, %v538_v34 }
 0x434   :  { %v534_v39 = vadd.f32 %v533_v37, %v532_v35  ;;  %v541_v40 = vrot.slane %v540_v38, 2 }
 0x436   :  { %v535_v41 = vrot.slane %v534_v39, 1  ;;  %v542_v42 = vadd.f32 %v541_v40, %v540_v38 }
 0x438   :  { %v536_v0 = vadd.f32 %v535_v41, %v534_v39  ;;  %v543_v43 = vrot.slane %v542_v42, 1 }
 0x43a   :  { %v537_v44 = vmul.f32 0.125, %v536_v0  ;;  %v544_v45 = vadd.f32 %v543_v43, %v542_v42 }
 0x43c   :  { %v545_v46 = vmul.f32 0.125, %v544_v45  ;;  %v546_v47 = vmul.f32 %v537_v44, %v537_v44  ;;  %v549_v51 = vsub.f32 %v530_v32, %v537_v44 }
 0x43e   :  { %v547_v48 = vsub.f32 %v545_v46, %v546_v47 }
 0x440   :  { %v548_v49 = vmax.f32 %v547_v48, 0.0 }
 0x442   :  { %v550_v50 = vadd.f32 1e-05, %v548_v49 }
 0x444   :  { %1080 = vrsqrt.f32 %v550_v50 }
 0x44e   :  { %v1081_v52 = vpop.eup %1080 }
 0x44f   :  { %v552_v54 = vmul.f32 %v1081_v52, %v549_v51 }
 0x451   :  { %v557_v56 = vmul.f32 %v682_v53, %v552_v54 }
 0x453   :  { %v562_v57 = vadd.f32 %v683_v55, %v557_v56 }
 0x455   :  { %943 = vmatmul.mubr.f32.vlgmr.msra.gmra.mrb[4].mxu0 %v562_v57 }
 0x528   :  { %v651_v59 = vpop.f32.mrb[4].mxu0 }
 0x529   :  { %v652_v60 = vadd.f32 %v684_v58, %v651_v59  ;;  %v944_v61 = vpop.f32.mrb[5].mxu0 }
 0x52b   :  { %655 = vst [vmem:[#allocation8] sm:$0xff] %v652_v60 }
 0x52c   :  { %1159 = shalt.err (!%p1156_p0)
}
 0x52d   :  { %s1160_s25 = scalar_lea.hbm %s1312_s3, 128 }
 0x52e   :  { %p1161_p1 = scmp.ne.s32.totalorder %s1312_s3, %s1160_s25  ;;  %p1164_p2 = scmp.lt.u32.totalorder %s1160_s25, %s1312_s3 }
 0x530   :  { %p1166_p3 = pnand %p1164_p2, %p1161_p1 }
 0x532   :  { %1169 = shalt.err (!%p1166_p3)
}
 0x533   :  { %665 = dma.vmem_to_hbm [thread:$0]  %s663_s21, 128, %s1312_s3, [#allocation4]  }
 0x534   :  { %1174 = dma.done.wait [#allocation4], 128  }
 0x535   :  { %1175 = vsyncadd [#allocation4], 4294967168 }
 0x536   :  { %669 = vsyncpa [#allocation3], 1 }
 0x537   :  { %670 = vsyncpa [#allocation6], 1 }
 0x538   :  { %671 = vsyncpa [#allocation4], 1 }

</bundles_post_ra>
